<compile_context>
chip_gen: v7x
topology: tpu7x:2x2x1
jax: 0.10.0
libtpu: 0.0.40
codegen_flags: <defaults>
</compile_context>

<pallas_src>
import functools
import math

import jax
import jax.numpy as jnp
from jax.experimental import pallas as pl
from jax.experimental.pallas import tpu as pltpu

BN_EPS = 1e-5
_LANE = 128


# ----------------------------------------------------------------------------
# Small helpers
# ----------------------------------------------------------------------------
def _round_up(n, m):
    return ((n + m - 1) // m) * m


def _pad128(n):
    return _round_up(n, _LANE)


def _pad2(a, rows, cols):
    return jnp.pad(a, ((0, rows - a.shape[0]), (0, cols - a.shape[1])))


def _pack_bgb(b, g, be, np_pad):
    """Pack bias / gamma / beta rows into one lane-dense (8, np_pad) slab.
    Padded gamma columns are 0 -> padded features stay exactly 0 after BN."""
    rows = jnp.concatenate(
        [b, g, be, jnp.zeros((5, b.shape[1]), jnp.float32)], axis=0)
    return _pad2(rows, 8, np_pad)


def _vmem_capacity_bytes():
    try:
        cap = getattr(pltpu.get_tpu_info(), "vmem_capacity_bytes", None)
        if cap:
            return int(cap)
    except Exception:
        pass
    return 64 * 1024 * 1024          # conservative (v7x per-core VMEM)


def _vmem_limit(need_bytes, cap_bytes):
    """Generous scoped-VMEM limit, but never below the computed need."""
    lim = max(2 * need_bytes, 32 * 1024 * 1024)
    lim = min(lim, max(cap_bytes - 8 * 1024 * 1024, 32 * 1024 * 1024))
    return int(max(lim, need_bytes))


def _fused_need_bytes(b_pad, k0p, layer_shapes, nlp, nop, itm):
    w_bytes = sum(kp * np_ * itm + 8 * np_ * 4 for (kp, np_) in layer_shapes)
    w_bytes += nlp * nop * itm + nop * 4
    act_bytes = b_pad * k0p * itm + b_pad * (nop + nlp) * 4
    widths = [k0p, nlp, nop] + [np_ for (_, np_) in layer_shapes]
    tmp_bytes = 6 * b_pad * max(widths) * 4      # headroom for in-kernel temps
    return int(w_bytes + act_bytes + tmp_bytes)


def _tile_need_bytes(tile_b, kp, np_, itm):
    return int(2 * kp * np_ * itm
               + 2 * tile_b * kp * max(itm, 4)
               + 2 * tile_b * (np_ + kp) * 4
               + 16 * (kp + np_) * 4)


def _pick_tile_b(b_pad, kp, np_, itm, cap_bytes):
    """Largest batch tile that divides the padded batch, keeps nt >= 2 when the
    batch allows (v7x megacore / pipelining), and fits a conservative VMEM
    budget for THIS layer's shapes (per-layer tiles)."""
    budget = max(cap_bytes // 2, 24 * 1024 * 1024)
    tile_cap = max(b_pad // 2, 8)
    for cand in (2048, 1024, 512, 256, 128, 64, 32, 16, 8):
        if cand > tile_cap or b_pad % cand:
            continue
        if _tile_need_bytes(cand, kp, np_, itm) <= budget:
            return cand
    return 8


# ----------------------------------------------------------------------------
# Fused whole-network kernel (primary path)
# ----------------------------------------------------------------------------
def _make_fused_kernel(n_layers, n_valid_batch, n_valid_out, mask_rows):
    inv_b = 1.0 / float(n_valid_batch)

    def kernel(*refs):
        # refs = [x] + [w_l, bgb_l]*n_layers + [wo, bo] + [out, h]
        x_ref = refs[0]
        wo_ref, bo_ref = refs[1 + 2 * n_layers], refs[2 + 2 * n_layers]
        out_ref, h_ref = refs[-2], refs[-1]

        h = x_ref[...]
        for l in range(n_layers):
            w_ref, bgb_ref = refs[1 + 2 * l], refs[2 + 2 * l]
            z = jnp.dot(h.astype(w_ref.dtype), w_ref[...],
                        preferred_element_type=jnp.float32)        # MXU, f32 acc
            z = jnp.maximum(z + bgb_ref[0:1, :], 0.0)              # +bias, ReLU
            if mask_rows:                                          # exclude pad rows
                row = jax.lax.broadcasted_iota(jnp.int32, z.shape, 0)
                valid = row < n_valid_batch
                zm = jnp.where(valid, z, 0.0)
                mean = jnp.sum(zm, axis=0, keepdims=True) * inv_b
                d = jnp.where(valid, z - mean, 0.0)
            else:
                mean = jnp.sum(z, axis=0, keepdims=True) * inv_b
                d = z - mean
            var = jnp.sum(d * d, axis=0, keepdims=True) * inv_b    # two-pass var
            inv = jax.lax.rsqrt(var + BN_EPS)
            scale = bgb_ref[1:2, :] * inv                          # gamma * inv
            shift = bgb_ref[2:3, :] - mean * scale                 # beta - mean*scale
            h = z * scale + shift                                  # BN output (f32)

        h_ref[...] = h.astype(h_ref.dtype)
        logits = jnp.dot(h.astype(wo_ref.dtype), wo_ref[...],
                         preferred_element_type=jnp.float32) + bo_ref[...]
        col = jax.lax.broadcasted_iota(jnp.int32, logits.shape, 1)
        logits = jnp.where(col < n_valid_out, logits, -1e30)       # mask pad cols
        m = jnp.max(logits, axis=-1, keepdims=True)
        e = jnp.exp(logits - m)
        denom = jnp.sum(e, axis=-1, keepdims=True)
        out_ref[...] = (e * pl.reciprocal(denom)).astype(out_ref.dtype)  # exact

    return kernel


# ----------------------------------------------------------------------------
# Per-layer fallback kernels (batch-tiled grid)
# ----------------------------------------------------------------------------
def _make_layer_kernel(n_valid_batch, tile_b, mask_rows):
    inv_b = 1.0 / float(n_valid_batch)

    def kernel(prev_ref, x_ref, w_ref, bgb_ref, z_ref, stats_ref, acc_ref):
        i = pl.program_id(0)

        # Fold the PREVIOUS layer's BN (raw stats + gamma/beta) into scale/shift
        # in-kernel (no wrapper-side stat reduction between layers).
        mean_p = prev_ref[0:1, :] * inv_b
        var_p = jnp.maximum(prev_ref[1:2, :] * inv_b - mean_p * mean_p, 0.0)
        inv_p = jax.lax.rsqrt(var_p + BN_EPS)
        scale = prev_ref[2:3, :] * inv_p
        shift = prev_ref[3:4, :] - mean_p * scale

        xn = x_ref[...].astype(jnp.float32) * scale + shift
        z = jnp.dot(xn.astype(w_ref.dtype), w_ref[...],
                    preferred_element_type=jnp.float32)
        z = jnp.maximum(z + bgb_ref[0:1, :], 0.0)
        z_ref[...] = z.astype(z_ref.dtype)

        if mask_rows:
            row = jax.lax.broadcasted_iota(jnp.int32, z.shape, 0) + i * tile_b
            zm = jnp.where(row < n_valid_batch, z, 0.0)
        else:
            zm = z
        s = jnp.sum(zm, axis=0, keepdims=True)
        sq = jnp.sum(zm * zm, axis=0, keepdims=True)

        @pl.when(i == 0)
        def _():
            acc_ref[...] = jnp.zeros_like(acc_ref)

        acc_ref[0:1, :] += s
        acc_ref[1:2, :] += sq

        @pl.when(i == pl.num_programs(0) - 1)
        def _():
            stats_ref[0:1, :] = acc_ref[0:1, :]           # sum
            stats_ref[1:2, :] = acc_ref[1:2, :]           # sum of squares
            stats_ref[2:3, :] = bgb_ref[1:2, :]           # gamma
            stats_ref[3:4, :] = bgb_ref[2:3, :]           # beta
            stats_ref[4:8, :] = jnp.zeros((4, s.shape[1]), jnp.float32)

    return kernel


def _make_head_kernel(n_valid_batch, n_valid_out):
    inv_b = 1.0 / float(n_valid_batch)

    def kernel(prev_ref, x_ref, w_ref, b_ref, out_ref, h_ref):
        mean_p = prev_ref[0:1, :] * inv_b
        var_p = jnp.maximum(prev_ref[1:2, :] * inv_b - mean_p * mean_p, 0.0)
        inv_p = jax.lax.rsqrt(var_p + BN_EPS)
        scale = prev_ref[2:3, :] * inv_p
        shift = prev_ref[3:4, :] - mean_p * scale

        h = x_ref[...].astype(jnp.float32) * scale + shift
        h_ref[...] = h.astype(h_ref.dtype)

        logits = jnp.dot(h.astype(w_ref.dtype), w_ref[...],
                         preferred_element_type=jnp.float32) + b_ref[...]
        col = jax.lax.broadcasted_iota(jnp.int32, logits.shape, 1)
        logits = jnp.where(col < n_valid_out, logits, -1e30)
        m = jnp.max(logits, axis=-1, keepdims=True)
        e = jnp.exp(logits - m)
        denom = jnp.sum(e, axis=-1, keepdims=True)
        out_ref[...] = (e * pl.reciprocal(denom)).astype(out_ref.dtype)

    return kernel


def _layer_call(prev, a, w, bgb, *, tile_b, n_valid_batch, vmem_limit):
    b_pad, kp = a.shape
    np_ = w.shape[1]
    nt = b_pad // tile_b
    itm = a.dtype.itemsize
    kernel = _make_layer_kernel(n_valid_batch, tile_b, n_valid_batch < b_pad)
    flops = 2 * b_pad * kp * np_
    bytes_accessed = (b_pad * kp * itm + kp * np_ * w.dtype.itemsize
                      + b_pad * np_ * itm + 8 * (kp + 2 * np_) * 4)
    return pl.pallas_call(
        kernel,
        grid=(nt,),
        in_specs=[
            pl.BlockSpec((8, kp), lambda i: (0, 0)),        # prev stats + gamma/beta
            pl.BlockSpec((tile_b, kp), lambda i: (i, 0)),   # activations (tiled)
            pl.BlockSpec((kp, np_), lambda i: (0, 0)),      # weight (resident)
            pl.BlockSpec((8, np_), lambda i: (0, 0)),       # bias / gamma / beta
        ],
        out_specs=(
            pl.BlockSpec((tile_b, np_), lambda i: (i, 0)),  # z (tiled)
            pl.BlockSpec((8, np_), lambda i: (0, 0)),       # stats (written once)
        ),
        out_shape=(
            jax.ShapeDtypeStruct((b_pad, np_), a.dtype),
            jax.ShapeDtypeStruct((8, np_), jnp.float32),
        ),
        scratch_shapes=[pltpu.VMEM((8, np_), jnp.float32)],
        compiler_params=pltpu.CompilerParams(
            dimension_semantics=("arbitrary",),             # stats accumulate
            vmem_limit_bytes=vmem_limit),
        cost_estimate=pl.CostEstimate(flops=int(flops), transcendentals=0,
                                      bytes_accessed=int(bytes_accessed)),
    )(prev, a, w, bgb)


def _head_call(prev, a, w, b, *, tile_b, n_valid_batch, n_valid_out, vmem_limit):
    b_pad, kp = a.shape
    np_ = w.shape[1]
    nt = b_pad // tile_b
    itm = a.dtype.itemsize
    kernel = _make_head_kernel(n_valid_batch, n_valid_out)
    flops = 2 * b_pad * kp * np_
    bytes_accessed = (b_pad * kp * itm + kp * np_ * w.dtype.itemsize
                      + b_pad * (np_ + kp) * 4 + (8 * kp + np_) * 4)
    return pl.pallas_call(
        kernel,
        grid=(nt,),
        in_specs=[
            pl.BlockSpec((8, kp), lambda i: (0, 0)),
            pl.BlockSpec((tile_b, kp), lambda i: (i, 0)),
            pl.BlockSpec((kp, np_), lambda i: (0, 0)),
            pl.BlockSpec((1, np_), lambda i: (0, 0)),
        ],
        out_specs=(
            pl.BlockSpec((tile_b, np_), lambda i: (i, 0)),  # softmax (lane-dense)
            pl.BlockSpec((tile_b, kp), lambda i: (i, 0)),   # latent h (lane-dense)
        ),
        out_shape=(
            jax.ShapeDtypeStruct((b_pad, np_), jnp.float32),
            jax.ShapeDtypeStruct((b_pad, kp), jnp.float32),
        ),
        compiler_params=pltpu.CompilerParams(
            dimension_semantics=("parallel",),              # disjoint blocks
            vmem_limit_bytes=vmem_limit),
        cost_estimate=pl.CostEstimate(flops=int(flops),
                                      transcendentals=int(b_pad * np_),
                                      bytes_accessed=int(bytes_accessed)),
    )(prev, a, w, b)


# ----------------------------------------------------------------------------
# Parameters
# ----------------------------------------------------------------------------
def init_params(key, n_input, factor, n_reduction_layers, n_latent, n_cancer_types):
    """PyTorch-style uniform Linear init; gamma=1 / beta=0 for BatchNorm1d.
    Weights stored as (in, out), biases/gamma/beta as (1, out), all f32."""
    params = []
    dims = [n_input]
    for cur in range(1, n_reduction_layers):
        dims.append(int(n_input * factor ** cur))

    def linear(key, fan_in, fan_out):
        k1, k2 = jax.random.split(key)
        bound = 1.0 / math.sqrt(fan_in)
        w = jax.random.uniform(k1, (fan_in, fan_out), jnp.float32, -bound, bound)
        b = jax.random.uniform(k2, (1, fan_out), jnp.float32, -bound, bound)
        return w, b

    for i in range(len(dims) - 1):                       # encoder layers
        key, sub = jax.random.split(key)
        w, b = linear(sub, dims[i], dims[i + 1])
        params += [w, b, jnp.ones((1, dims[i + 1]), jnp.float32),
                   jnp.zeros((1, dims[i + 1]), jnp.float32)]

    key, sub = jax.random.split(key)                     # latent layer
    wl, bl = linear(sub, dims[-1], n_latent)
    params += [wl, bl, jnp.ones((1, n_latent), jnp.float32),
               jnp.zeros((1, n_latent), jnp.float32)]

    key, sub = jax.random.split(key)                     # output layer
    wo, bo = linear(sub, n_latent, n_cancer_types)
    params += [wo, bo]
    return params


def prepare_params(params, n_enc_layers, matmul_dtype=jnp.float32):
    """Pad (lane-dense), pack, and cast parameters ONCE, outside the forward."""
    mdt = jnp.dtype(matmul_dtype)
    layers, idx = [], 0
    for _ in range(n_enc_layers + 1):
        w, b, g, be = params[idx:idx + 4]
        idx += 4
        kp, np_ = _pad128(w.shape[0]), _pad128(w.shape[1])
        layers.append((_pad2(w, kp, np_).astype(mdt), _pack_bgb(b, g, be, np_)))
    wo, bo = params[idx], params[idx + 1]
    nlp, nop = _pad128(wo.shape[0]), _pad128(wo.shape[1])
    return (tuple(layers), _pad2(wo, nlp, nop).astype(mdt), _pad2(bo, 1, nop))


# ----------------------------------------------------------------------------
# Forward
# ----------------------------------------------------------------------------
@functools.partial(jax.jit,
                   static_argnames=("n_latent", "n_cancer_types", "force_per_layer"))
def net_forward(x, prepared, *, n_latent, n_cancer_types, force_per_layer=False):
    layers, wop, bop = prepared
    layers = tuple(layers)
    mdt = jnp.dtype(wop.dtype)
    batch, n_in = x.shape
    b_pad = _round_up(max(batch, 8), 8)
    k0p = _pad128(n_in)
    xp = jnp.pad(x.astype(jnp.float32),
                 ((0, b_pad - batch), (0, k0p - n_in))).astype(mdt)

    cap = _vmem_capacity_bytes()
    layer_shapes = [(int(w.shape[0]), int(w.shape[1])) for (w, _) in layers]
    nlp, nop = int(wop.shape[0]), int(wop.shape[1])
    flops = sum(2 * b_pad * kp * np_ for (kp, np_) in layer_shapes) \
        + 2 * b_pad * nlp * nop

    need_fused = _fused_need_bytes(b_pad, k0p, layer_shapes, nlp, nop, mdt.itemsize)
    use_fused = (not force_per_layer) and need_fused <= (3 * cap) // 4

    if use_fused:
        # Whole network in ONE kernel: batch + weights resident in VMEM, BN batch
        # stats computed in-kernel, no per-layer HBM round trips.
        # TODO(synk): the fused path runs on a single TensorCore; using both v7x
        # cores would need cross-core BN-stat exchange (CMEM / core_barrier).
        kernel = _make_fused_kernel(len(layers), batch, n_cancer_types,
                                    batch < b_pad)
        args = [xp]
        for (w, bgb) in layers:
            args.extend([w, bgb])
        args.extend([wop, bop])
        in_bytes = sum(int(a.size) * a.dtype.itemsize for a in args)
        out_bytes = b_pad * (nop + nlp) * 4
        out_pad, h_pad = pl.pallas_call(
            kernel,
            out_shape=(jax.ShapeDtypeStruct((b_pad, nop), jnp.float32),
                       jax.ShapeDtypeStruct((b_pad, nlp), jnp.float32)),
            compiler_params=pltpu.CompilerParams(
                vmem_limit_bytes=_vmem_limit(need_fused, cap)),
            cost_estimate=pl.CostEstimate(flops=int(flops),
                                          transcendentals=int(b_pad * nop),
                                          bytes_accessed=int(in_bytes + out_bytes)),
        )(*args)
    else:
        # TODO(synk): layers whose padded weight block alone exceeds VMEM
        # (genomics-scale n_input) additionally need K/N streaming of W via
        # memory_space=pl.ANY + pltpu.emit_pipeline; this fallback tiles batch only.
        prev = jnp.zeros((8, k0p), jnp.float32)           # identity "BN" for layer 0:
        prev = prev.at[1, :].set(float(batch) * (1.0 - BN_EPS))   # var -> 1-eps
        prev = prev.at[2, :].set(1.0)                             # gamma = 1
        a = xp
        for (w, bgb) in layers:
            kp, np_ = int(w.shape[0]), int(w.shape[1])
            tile_b = _pick_tile_b(b_pad, kp, np_, mdt.itemsize, cap)
            need = _tile_need_bytes(tile_b, kp, np_, mdt.itemsize)
            z, stats = _layer_call(prev, a, w, bgb, tile_b=tile_b,
                                   n_valid_batch=batch,
                                   vmem_limit=_vmem_limit(need, cap))
            prev, a = stats, z
        tile_b = _pick_tile_b(b_pad, nlp, nop, mdt.itemsize, cap)
        need = _tile_need_bytes(tile_b, nlp, nop, mdt.itemsize)
        out_pad, h_pad = _head_call(prev, a, wop, bop, tile_b=tile_b,
                                    n_valid_batch=batch,
                                    n_valid_out=n_cancer_types,
                                    vmem_limit=_vmem_limit(need, cap))

    return out_pad[:batch, :n_cancer_types], h_pad[:batch, :n_latent]


# ----------------------------------------------------------------------------
# Pure-JAX reference (matches PyTorch semantics)
# ----------------------------------------------------------------------------
def _batchnorm1d_train(h, gamma, beta):
    mean = jnp.mean(h, axis=0, keepdims=True)
    var = jnp.mean((h - mean) * (h - mean), axis=0, keepdims=True)
    return (h - mean) * jax.lax.rsqrt(var + BN_EPS) * gamma + beta


def _reference_forward(x, params, n_enc_layers, matmul_dtype=jnp.float32):
    mdt = jnp.dtype(matmul_dtype)

    def dot(a, w):
        return jnp.dot(a.astype(mdt), w.astype(mdt),
                       preferred_element_type=jnp.float32)

    h, idx = x, 0
    for _ in range(n_enc_layers + 1):
        w, b, g, be = params[idx:idx + 4]
        idx += 4
        h = _batchnorm1d_train(jnp.maximum(dot(h, w) + b, 0.0), g, be)
    wo, bo = params[idx], params[idx + 1]
    return jax.nn.softmax(dot(h, wo) + bo, axis=-1), h


# ----------------------------------------------------------------------------
if __name__ == "__main__":
    root = jax.random.PRNGKey(0)

    def run_case(case_id, *, batch, n_input, factor, n_reduction_layers, n_latent,
                 n_types, matmul_dtype, force_per_layer, atol_h, atol_out):
        kx, kp = jax.random.split(jax.random.fold_in(root, case_id))
        x = jax.random.normal(kx, (batch, n_input), jnp.float32)
        params = init_params(kp, n_input, factor, n_reduction_layers,
                             n_latent, n_types)
        n_enc_layers = n_reduction_layers - 1
        prepared = prepare_params(params, n_enc_layers, matmul_dtype=matmul_dtype)
        out, h = net_forward(x, prepared, n_latent=n_latent, n_cancer_types=n_types,
                             force_per_layer=force_per_layer)
        jax.block_until_ready((out, h))
        ref_out, ref_h = _reference_forward(x, params, n_enc_layers, matmul_dtype)
        assert out.shape == (batch, n_types) and h.shape == (batch, n_latent)
        assert jnp.allclose(h, ref_h, atol=atol_h, rtol=atol_h), \
            f"case {case_id}: latent mismatch"
        assert jnp.allclose(out, ref_out, atol=atol_out, rtol=atol_out), \
            f"case {case_id}: softmax mismatch"

    # 1) Fused single-kernel path, f32; batch not a sublane multiple, which
    #    exercises the in-kernel masking of padded rows in the BN statistics.
    run_case(0, batch=12, n_input=32, factor=0.5, n_reduction_layers=2,
             n_latent=2, n_types=2, matmul_dtype=jnp.float32,
             force_per_layer=False, atol_h=1e-3, atol_out=1e-3)

    # 2) Fused path with bf16 MXU operands (f32 accumulation; BN/softmax in f32).
    run_case(1, batch=8, n_input=32, factor=0.5, n_reduction_layers=2,
             n_latent=2, n_types=2, matmul_dtype=jnp.bfloat16,
             force_per_layer=False, atol_h=1e-1, atol_out=5e-2)

    # 3) Per-layer fallback (batch-tiled grid + in-kernel BN-stat accumulation),
    #    deeper stack, ragged batch, output width != latent width.
    run_case(2, batch=60, n_input=32, factor=0.5, n_reduction_layers=3,
             n_latent=2, n_types=3, matmul_dtype=jnp.float32,
             force_per_layer=True, atol_h=2e-3, atol_out=2e-3)

    print("KERNEL_OK")
</pallas_src>

<mosaic_0001>
module attributes {stable_mosaic.version = 11 : i64} {
  func.func @kernel(%arg0: memref<16x128xf32, #tpu.memory_space<vmem>>, %arg1: memref<128x128xf32, #tpu.memory_space<vmem>>, %arg2: memref<8x128xf32, #tpu.memory_space<vmem>>, %arg3: memref<128x128xf32, #tpu.memory_space<vmem>>, %arg4: memref<8x128xf32, #tpu.memory_space<vmem>>, %arg5: memref<128x128xf32, #tpu.memory_space<vmem>>, %arg6: memref<1x128xf32, #tpu.memory_space<vmem>>, %arg7: memref<16x128xf32, #tpu.memory_space<vmem>>, %arg8: memref<16x128xf32, #tpu.memory_space<vmem>>) attributes {dimension_semantics = [], scalar_prefetch = 0 : i64, scratch_operands = 0 : i64, tpu.core_type = #tpu.core_type<tc>} {
    %c0 = arith.constant 0 : index
    %c0_0 = arith.constant 0 : index
    %0 = vector.load %arg0[%c0, %c0_0] : memref<16x128xf32, #tpu.memory_space<vmem>>, vector<16x128xf32>
    %c0_1 = arith.constant 0 : index
    %c0_2 = arith.constant 0 : index
    %1 = vector.load %arg1[%c0_1, %c0_2] : memref<128x128xf32, #tpu.memory_space<vmem>>, vector<128x128xf32>
    %cst = arith.constant dense<0.000000e+00> : vector<16x128xf32>
    %2 = tpu.matmul %0, %1, %cst {dimension_numbers = #tpu.dot_dimension_numbers<[1], [0], [0], [1], [0, 0, 1, 1], [], []>} : vector<16x128xf32>, vector<128x128xf32>, vector<16x128xf32> -> vector<16x128xf32>
    %c0_3 = arith.constant 0 : index
    %c0_4 = arith.constant 0 : index
    %3 = vector.load %arg2[%c0_3, %c0_4] : memref<8x128xf32, #tpu.memory_space<vmem>>, vector<1x128xf32>
    %4 = vector.broadcast %3 : vector<1x128xf32> to vector<16x128xf32>
    %5 = arith.addf %2, %4 : vector<16x128xf32>
    %cst_5 = arith.constant 0.000000e+00 : f32
    %6 = vector.broadcast %cst_5 : f32 to vector<16x128xf32>
    %7 = arith.maximumf %5, %6 : vector<16x128xf32>
    %8 = tpu.iota {dimensions = array<i32: 0>} : vector<16x128xi32>
    %c12_i32 = arith.constant 12 : i32
    %9 = vector.broadcast %c12_i32 : i32 to vector<16x128xi32>
    %10 = arith.cmpi slt, %8, %9 : vector<16x128xi32>
    %cst_6 = arith.constant 0.000000e+00 : f32
    %11 = vector.broadcast %cst_6 : f32 to vector<16x128xf32>
    %12 = arith.select %10, %7, %11 : vector<16x128xi1>, vector<16x128xf32>
    %cst_7 = arith.constant dense<0.000000e+00> : vector<128xf32>
    %13 = vector.multi_reduction <add>, %12, %cst_7 [0] : vector<16x128xf32> to vector<128xf32>
    %14 = vector.shape_cast %13 : vector<128xf32> to vector<1x128xf32>
    %cst_8 = arith.constant 0.0833333358 : f32
    %15 = vector.broadcast %cst_8 : f32 to vector<1x128xf32>
    %16 = arith.mulf %14, %15 : vector<1x128xf32>
    %17 = vector.broadcast %16 : vector<1x128xf32> to vector<16x128xf32>
    %18 = arith.subf %7, %17 : vector<16x128xf32>
    %cst_9 = arith.constant 0.000000e+00 : f32
    %19 = vector.broadcast %cst_9 : f32 to vector<16x128xf32>
    %20 = arith.select %10, %18, %19 : vector<16x128xi1>, vector<16x128xf32>
    %21 = arith.mulf %20, %20 : vector<16x128xf32>
    %cst_10 = arith.constant dense<0.000000e+00> : vector<128xf32>
    %22 = vector.multi_reduction <add>, %21, %cst_10 [0] : vector<16x128xf32> to vector<128xf32>
    %23 = vector.shape_cast %22 : vector<128xf32> to vector<1x128xf32>
    %cst_11 = arith.constant 0.0833333358 : f32
    %24 = vector.broadcast %cst_11 : f32 to vector<1x128xf32>
    %25 = arith.mulf %23, %24 : vector<1x128xf32>
    %cst_12 = arith.constant 9.99999974E-6 : f32
    %26 = vector.broadcast %cst_12 : f32 to vector<1x128xf32>
    %27 = arith.addf %25, %26 : vector<1x128xf32>
    %28 = math.rsqrt %27 : vector<1x128xf32>
    %c1 = arith.constant 1 : index
    %c0_13 = arith.constant 0 : index
    %29 = vector.load %arg2[%c1, %c0_13] : memref<8x128xf32, #tpu.memory_space<vmem>>, vector<1x128xf32>
    %30 = arith.mulf %29, %28 : vector<1x128xf32>
    %c2 = arith.constant 2 : index
    %c0_14 = arith.constant 0 : index
    %31 = vector.load %arg2[%c2, %c0_14] : memref<8x128xf32, #tpu.memory_space<vmem>>, vector<1x128xf32>
    %32 = arith.mulf %16, %30 : vector<1x128xf32>
    %33 = arith.subf %31, %32 : vector<1x128xf32>
    %34 = vector.broadcast %30 : vector<1x128xf32> to vector<16x128xf32>
    %35 = arith.mulf %7, %34 : vector<16x128xf32>
    %36 = vector.broadcast %33 : vector<1x128xf32> to vector<16x128xf32>
    %37 = arith.addf %35, %36 : vector<16x128xf32>
    %c0_15 = arith.constant 0 : index
    %c0_16 = arith.constant 0 : index
    %38 = vector.load %arg3[%c0_15, %c0_16] : memref<128x128xf32, #tpu.memory_space<vmem>>, vector<128x128xf32>
    %cst_17 = arith.constant dense<0.000000e+00> : vector<16x128xf32>
    %39 = tpu.matmul %37, %38, %cst_17 {dimension_numbers = #tpu.dot_dimension_numbers<[1], [0], [0], [1], [0, 0, 1, 1], [], []>} : vector<16x128xf32>, vector<128x128xf32>, vector<16x128xf32> -> vector<16x128xf32>
    %c0_18 = arith.constant 0 : index
    %c0_19 = arith.constant 0 : index
    %40 = vector.load %arg4[%c0_18, %c0_19] : memref<8x128xf32, #tpu.memory_space<vmem>>, vector<1x128xf32>
    %41 = vector.broadcast %40 : vector<1x128xf32> to vector<16x128xf32>
    %42 = arith.addf %39, %41 : vector<16x128xf32>
    %cst_20 = arith.constant 0.000000e+00 : f32
    %43 = vector.broadcast %cst_20 : f32 to vector<16x128xf32>
    %44 = arith.maximumf %42, %43 : vector<16x128xf32>
    %45 = tpu.iota {dimensions = array<i32: 0>} : vector<16x128xi32>
    %c12_i32_21 = arith.constant 12 : i32
    %46 = vector.broadcast %c12_i32_21 : i32 to vector<16x128xi32>
    %47 = arith.cmpi slt, %45, %46 : vector<16x128xi32>
    %cst_22 = arith.constant 0.000000e+00 : f32
    %48 = vector.broadcast %cst_22 : f32 to vector<16x128xf32>
    %49 = arith.select %47, %44, %48 : vector<16x128xi1>, vector<16x128xf32>
    %cst_23 = arith.constant dense<0.000000e+00> : vector<128xf32>
    %50 = vector.multi_reduction <add>, %49, %cst_23 [0] : vector<16x128xf32> to vector<128xf32>
    %51 = vector.shape_cast %50 : vector<128xf32> to vector<1x128xf32>
    %cst_24 = arith.constant 0.0833333358 : f32
    %52 = vector.broadcast %cst_24 : f32 to vector<1x128xf32>
    %53 = arith.mulf %51, %52 : vector<1x128xf32>
    %54 = vector.broadcast %53 : vector<1x128xf32> to vector<16x128xf32>
    %55 = arith.subf %44, %54 : vector<16x128xf32>
    %cst_25 = arith.constant 0.000000e+00 : f32
    %56 = vector.broadcast %cst_25 : f32 to vector<16x128xf32>
    %57 = arith.select %47, %55, %56 : vector<16x128xi1>, vector<16x128xf32>
    %58 = arith.mulf %57, %57 : vector<16x128xf32>
    %cst_26 = arith.constant dense<0.000000e+00> : vector<128xf32>
    %59 = vector.multi_reduction <add>, %58, %cst_26 [0] : vector<16x128xf32> to vector<128xf32>
    %60 = vector.shape_cast %59 : vector<128xf32> to vector<1x128xf32>
    %cst_27 = arith.constant 0.0833333358 : f32
    %61 = vector.broadcast %cst_27 : f32 to vector<1x128xf32>
    %62 = arith.mulf %60, %61 : vector<1x128xf32>
    %cst_28 = arith.constant 9.99999974E-6 : f32
    %63 = vector.broadcast %cst_28 : f32 to vector<1x128xf32>
    %64 = arith.addf %62, %63 : vector<1x128xf32>
    %65 = math.rsqrt %64 : vector<1x128xf32>
    %c1_29 = arith.constant 1 : index
    %c0_30 = arith.constant 0 : index
    %66 = vector.load %arg4[%c1_29, %c0_30] : memref<8x128xf32, #tpu.memory_space<vmem>>, vector<1x128xf32>
    %67 = arith.mulf %66, %65 : vector<1x128xf32>
    %c2_31 = arith.constant 2 : index
    %c0_32 = arith.constant 0 : index
    %68 = vector.load %arg4[%c2_31, %c0_32] : memref<8x128xf32, #tpu.memory_space<vmem>>, vector<1x128xf32>
    %69 = arith.mulf %53, %67 : vector<1x128xf32>
    %70 = arith.subf %68, %69 : vector<1x128xf32>
    %71 = vector.broadcast %67 : vector<1x128xf32> to vector<16x128xf32>
    %72 = arith.mulf %44, %71 : vector<16x128xf32>
    %73 = vector.broadcast %70 : vector<1x128xf32> to vector<16x128xf32>
    %74 = arith.addf %72, %73 : vector<16x128xf32>
    %c0_33 = arith.constant 0 : index
    %c0_34 = arith.constant 0 : index
    %75 = vector.load %arg8[%c0_33, %c0_34] : memref<16x128xf32, #tpu.memory_space<vmem>>, vector<16x128xf32>
    tpu.vector_store %arg8[%c0_33, %c0_34], %74 {strides = array<i32>} : memref<16x128xf32, #tpu.memory_space<vmem>>, vector<16x128xf32>,
    %c0_35 = arith.constant 0 : index
    %c0_36 = arith.constant 0 : index
    %76 = vector.load %arg5[%c0_35, %c0_36] : memref<128x128xf32, #tpu.memory_space<vmem>>, vector<128x128xf32>
    %cst_37 = arith.constant dense<0.000000e+00> : vector<16x128xf32>
    %77 = tpu.matmul %74, %76, %cst_37 {dimension_numbers = #tpu.dot_dimension_numbers<[1], [0], [0], [1], [0, 0, 1, 1], [], []>} : vector<16x128xf32>, vector<128x128xf32>, vector<16x128xf32> -> vector<16x128xf32>
    %c0_38 = arith.constant 0 : index
    %c0_39 = arith.constant 0 : index
    %78 = vector.load %arg6[%c0_38, %c0_39] : memref<1x128xf32, #tpu.memory_space<vmem>>, vector<1x128xf32>
    %79 = vector.broadcast %78 : vector<1x128xf32> to vector<16x128xf32>
    %80 = arith.addf %77, %79 : vector<16x128xf32>
    %81 = tpu.iota {dimensions = array<i32: 1>} : vector<16x128xi32>
    %c2_i32 = arith.constant 2 : i32
    %82 = vector.broadcast %c2_i32 : i32 to vector<16x128xi32>
    %83 = arith.cmpi slt, %81, %82 : vector<16x128xi32>
    %cst_40 = arith.constant -1.000000e+30 : f32
    %84 = vector.broadcast %cst_40 : f32 to vector<16x128xf32>
    %85 = arith.select %83, %80, %84 : vector<16x128xi1>, vector<16x128xf32>
    %cst_41 = arith.constant dense<0xFF800000> : vector<16xf32>
    %86 = vector.multi_reduction <maximumf>, %85, %cst_41 [1] : vector<16x128xf32> to vector<16xf32>
    %87 = vector.shape_cast %86 : vector<16xf32> to vector<16x1xf32>
    %88 = vector.broadcast %87 : vector<16x1xf32> to vector<16x128xf32>
    %89 = arith.subf %85, %88 : vector<16x128xf32>
    %90 = math.exp %89 : vector<16x128xf32>
    %cst_42 = arith.constant dense<0.000000e+00> : vector<16xf32>
    %91 = vector.multi_reduction <add>, %90, %cst_42 [1] : vector<16x128xf32> to vector<16xf32>
    %92 = vector.shape_cast %91 : vector<16xf32> to vector<16x1xf32>
    %93 = tpu.reciprocal %92 : vector<16x1xf32> -> vector<16x1xf32>
    %94 = vector.broadcast %93 : vector<16x1xf32> to vector<16x128xf32>
    %95 = arith.mulf %90, %94 : vector<16x128xf32>
    %c0_43 = arith.constant 0 : index
    %c0_44 = arith.constant 0 : index
    %96 = vector.load %arg7[%c0_43, %c0_44] : memref<16x128xf32, #tpu.memory_space<vmem>>, vector<16x128xf32>
    tpu.vector_store %arg7[%c0_43, %c0_44], %95 {strides = array<i32>} : memref<16x128xf32, #tpu.memory_space<vmem>>, vector<16x128xf32>,
    return
  }
}

</mosaic_0001>

<bundles_post_ra>
// kernel: net_forward.1
= control target key start
LH: loop header
LB: loop body
LE: loop exit
PB: predicated region body
PF: predicated region fallthrough
CT: control target
= control target key end

     0   :  { %14 = vsyncpa [#allocation3], 0  ;;  %s998_s0 = inlined_call_operand.vmem [shape: f32[16,128], index: 0, kind: input, shape index: {}]   ;;  %s999_s1 = inlined_call_operand.hbm [shape: f32[128,128], index: 1, kind: input, shape index: {}]   ;;  %s1000_s2 = inlined_call_operand.vmem [shape: f32[8,128], index: 2, kind: input, shape index: {}]   ;;  %s1001_s3 = inlined_call_operand.hbm [shape: f32[128,128], index: 3, kind: input, shape index: {}]   ;;  %s1002_s4 = inlined_call_operand.vmem [shape: f32[8,128], index: 4, kind: input, shape index: {}]   ;;  %s1003_s5 = inlined_call_operand.hbm [shape: f32[128,128], index: 5, kind: input, shape index: {}]   ;;  %s1004_s6 = inlined_call_operand.vmem [shape: f32[1,128], index: 6, kind: input, shape index: {}]   ;;  %s1005_s7 = inlined_call_operand.vmem [shape: f32[16,128], index: 7, kind: output, shape index: {0}]   ;;  %s1006_s8 = inlined_call_operand.vmem [shape: f32[16,128], index: 8, kind: output, shape index: {1}]  }
   0x1   :  { %15 = vsyncpa [#allocation5], 0  ;;  %s838_s27 = smov [#allocation4]   ;;  %s839_s29 = smov [#allocation2]  }
   0x2   :  { %s37_s28 = sshll.u32 %s838_s27, 4  ;;  %s23_s30 = sshll.u32 %s839_s29, 4  ;;  %s38_s28 = int_to_ptr.vmem [resolvable:$true] %s37_s28  ;;  %s888_s30 = int_to_ptr.vmem [resolvable:$true] %s23_s30 }
   0x3   :  { %s768_s11 = scalar_lea.hbm %s1001_s3, 2048 }
   0x4   :  { %p769_p0 = scmp.ne.s32.totalorder %s1001_s3, %s768_s11  ;;  %p772_p1 = scmp.lt.u32.totalorder %s768_s11, %s1001_s3 }
   0x6   :  { %p774_p2 = pnand %p772_p1, %p769_p0 }
   0x8   :  { %777 = shalt.err (!%p774_p2)
}
   0x9   :  { %s778_s16 = scalar_lea.vmem %s38_s28, 2048  ;;  %p783_p4 = scmp.lt.s32.totalorder %s38_s28, %s38_s28 }
   0xa   :  { %p779_p3 = scmp.ne.s32.totalorder %s38_s28, %s778_s16  ;;  %p784_p5 = scmp.lt.s32.totalorder %s778_s16, %s778_s16 }
   0xc   :  { %p785_p6 = por %p784_p5, %p783_p4 }
   0xe   :  { %p786_p7 = pnand %p785_p6, %p779_p3 }
  0x10   :  { %789 = shalt.err (!%p786_p7)
}
  0x11   :  { %s840_s17 = smov 128   ;;  %s841_s18 = smov 8  }
  0x12   :  { %43 = dma.hbm_to_vmem [thread:$0]  %s1001_s3, 2048, %s38_s28, [#allocation5], %s840_s17, %s840_s17, %s841_s18  }
  0x13   :  { %s790_s23 = scalar_lea.hbm %s999_s1, 2048 }
  0x14   :  { %p791_p8 = scmp.ne.s32.totalorder %s999_s1, %s790_s23  ;;  %p794_p9 = scmp.lt.u32.totalorder %s790_s23, %s999_s1 }
  0x16   :  { %p796_p10 = pnand %p794_p9, %p791_p8 }
  0x18   :  { %799 = shalt.err (!%p796_p10)
}
  0x19   :  { %s800_s29 = scalar_lea.vmem %s888_s30, 2048  ;;  %p805_p12 = scmp.lt.s32.totalorder %s888_s30, %s888_s30 }
  0x1a   :  { %p801_p11 = scmp.ne.s32.totalorder %s888_s30, %s800_s29  ;;  %p806_p13 = scmp.lt.s32.totalorder %s800_s29, %s800_s29 }
  0x1c   :  { %p807_p0 = por %p806_p13, %p805_p12 }
  0x1e   :  { %p808_p1 = pnand %p807_p0, %p801_p11 }
  0x20   :  { %811 = shalt.err (!%p808_p1)
}
  0x21   :  { %29 = dma.hbm_to_vmem [thread:$0]  %s999_s1, 2048, %s888_s30, [#allocation3], %s840_s17, %s840_s17, %s841_s18  }
  0x22   :  { %s842_s9 = smov [#allocation6]   ;;  %s812_s13 = scalar_lea.hbm %s1003_s5, 2048 }
  0x23   :  { %s51_s10 = sshll.u32 %s842_s9, 4  ;;  %p813_p2 = scmp.ne.s32.totalorder %s1003_s5, %s812_s13  ;;  %s52_s10 = int_to_ptr.vmem [resolvable:$true] %s51_s10 }
  0x24   :  { %p816_p3 = scmp.lt.u32.totalorder %s812_s13, %s1003_s5 }
  0x26   :  { %p818_p4 = pnand %p816_p3, %p813_p2 }
  0x28   :  { %821 = shalt.err (!%p818_p4)
}
  0x29   :  { %s822_s20 = scalar_lea.vmem %s52_s10, 2048  ;;  %p827_p6 = scmp.lt.s32.totalorder %s52_s10, %s52_s10 }
  0x2a   :  { %p823_p5 = scmp.ne.s32.totalorder %s52_s10, %s822_s20  ;;  %p828_p7 = scmp.lt.s32.totalorder %s822_s20, %s822_s20 }
  0x2c   :  { %p829_p8 = por %p828_p7, %p827_p6 }
  0x2e   :  { %p830_p9 = pnand %p829_p8, %p823_p5 }
  0x30   :  { %833 = shalt.err (!%p830_p9)
}
  0x31   :  { %57 = dma.hbm_to_vmem [thread:$0]  %s1003_s5, 2048, %s52_s10, [#allocation5], %s840_s17, %s840_s17, %s841_s18  }
  0x32   :  { %834 = dma.done.wait [#allocation3], 2048  }
  0x33   :  { %835 = vsyncadd [#allocation3], 4294965248 }
  0x34   :  { %836 = dma.done.wait [#allocation5], 4096  }
  0x35   :  { %837 = vsyncadd [#allocation5], 4294963200  ;;  %v71_v0 = vld [vmem:[#allocation2] sm:$0xff]  ;;  %v72_v1 = vld [vmem:[#allocation2 + $0x8] sm:$0xff]  ;;  %v169_v50 = vlaneseq }
  0x36   :  { %v73_v2 = vld [vmem:[#allocation2 + $0x10] sm:$0xff]  ;;  %v655_v3 = vpack.c.bf16 %v72_v1, %v71_v0  ;;  %v74_v4 = vld [vmem:[#allocation2 + $0x18] sm:$0xff]  ;;  %v75_v6 = vld [vmem:[#allocation2 + $0x20] sm:$0xff] }
  0x37   :  { %v659_v5 = vpack.c.bf16 %v74_v4, %v73_v2  ;;  %v76_v7 = vld [vmem:[#allocation2 + $0x28] sm:$0xff]  ;;  %v69_v9 = vld [vmem:[%s998_s0] sm:$0xff]  ;;  %v77_v10 = vld [vmem:[#allocation2 + $0x30] sm:$0xff]  ;;  %v170_v51 = vshrl.u32 %v169_v50, 7 }
  0x38   :  { %656 = vmatprep.subr.bf16.mxu0 %v655_v3  ;;  %v663_v8 = vpack.c.bf16 %v76_v7, %v75_v6  ;;  %v78_v11 = vld [vmem:[#allocation2 + $0x38] sm:$0xff]  ;;  %582 = vmatprep.mubr.f32.mxu0 %v69_v9  ;;  %v79_v13 = vld [vmem:[#allocation2 + $0x40] sm:$0xff]  ;;  %v80_v14 = vld [vmem:[#allocation2 + $0x48] sm:$0xff] }
  0x39   :  { %658 = vmatpush3.bf16.msra.mxu0 %v655_v3  ;;  %v667_v12 = vpack.c.bf16 %v78_v11, %v77_v10  ;;  %v671_v15 = vpack.c.bf16 %v80_v14, %v79_v13  ;;  %v81_v16 = vld [vmem:[#allocation2 + $0x50] sm:$0xff]  ;;  %v82_v17 = vld [vmem:[#allocation2 + $0x58] sm:$0xff]  ;;  %v83_v19 = vld [vmem:[#allocation2 + $0x60] sm:$0xff]  ;;  %v950_v53 = vadd.s32 8, %v170_v51 }
  0x3a   :  { %660 = vmatprep.subr.bf16.mxu0 %v659_v5  ;;  %v675_v18 = vpack.c.bf16 %v82_v17, %v81_v16  ;;  %v84_v20 = vld [vmem:[#allocation2 + $0x68] sm:$0xff]  ;;  %v85_v22 = vld [vmem:[#allocation2 + $0x70] sm:$0xff]  ;;  %v86_v23 = vld [vmem:[#allocation2 + $0x78] sm:$0xff] }
  0x3b   :  { %v679_v21 = vpack.c.bf16 %v84_v20, %v83_v19  ;;  %v683_v24 = vpack.c.bf16 %v86_v23, %v85_v22  ;;  %v70_v25 = vld [vmem:[%s998_s0 + $0x8] sm:$0xff]  ;;  %v217_v26 = vld [vmem:[#allocation4] sm:$0xff]  ;;  %v219_v29 = vld [vmem:[#allocation4 + $0x10] sm:$0xff]  ;;  %vm173_vm0 = vcmp.lt.s32.totalorder %v950_v53, 12  ;;  %v960_v20 = vsub.s32 0, %v170_v51 }
  0x3c   :  { %v218_v27 = vld [vmem:[#allocation4 + $0x8] sm:$0xff]  ;;  %v220_v30 = vld [vmem:[#allocation4 + $0x18] sm:$0xff]  ;;  %v221_v32 = vld [vmem:[#allocation4 + $0x20] sm:$0xff] }
  0x3d   :  { %662 = vmatpush3.bf16.msra.mxu0 %v659_v5  ;;  %v687_v28 = vpack.c.bf16 %v218_v27, %v217_v26  ;;  %v691_v31 = vpack.c.bf16 %v220_v30, %v219_v29  ;;  %v222_v33 = vld [vmem:[#allocation4 + $0x28] sm:$0xff]  ;;  %v223_v35 = vld [vmem:[#allocation4 + $0x30] sm:$0xff]  ;;  %v224_v36 = vld [vmem:[#allocation4 + $0x38] sm:$0xff] }
  0x3e   :  { %664 = vmatprep.subr.bf16.mxu0 %v663_v8  ;;  %v695_v34 = vpack.c.bf16 %v222_v33, %v221_v32  ;;  %v699_v37 = vpack.c.bf16 %v224_v36, %v223_v35  ;;  %v225_v38 = vld [vmem:[#allocation4 + $0x40] sm:$0xff]  ;;  %v226_v39 = vld [vmem:[#allocation4 + $0x48] sm:$0xff]  ;;  %v227_v41 = vld [vmem:[#allocation4 + $0x50] sm:$0xff] }
  0x3f   :  { %688 = vmatprep.subr.bf16.mxu1 %v687_v28  ;;  %v703_v40 = vpack.c.bf16 %v226_v39, %v225_v38  ;;  %v228_v42 = vld [vmem:[#allocation4 + $0x58] sm:$0xff]  ;;  %v229_v44 = vld [vmem:[#allocation4 + $0x60] sm:$0xff]  ;;  %v230_v45 = vld [vmem:[#allocation4 + $0x68] sm:$0xff] }
  0x40   :  { %690 = vmatpush3.bf16.msra.mxu1 %v687_v28  ;;  %v707_v43 = vpack.c.bf16 %v228_v42, %v227_v41  ;;  %v711_v46 = vpack.c.bf16 %v230_v45, %v229_v44  ;;  %v231_v47 = vld [vmem:[#allocation4 + $0x70] sm:$0xff]  ;;  %v232_v48 = vld [vmem:[#allocation4 + $0x78] sm:$0xff]  ;;  %v493_v52 = vld [vmem:[%s1000_s2] ss:$0 sm:$0xff] }
  0x41   :  { %666 = vmatpush3.bf16.msra.mxu0 %v663_v8  ;;  %692 = vmatprep.subr.bf16.mxu1 %v691_v31  ;;  %v715_v49 = vpack.c.bf16 %v232_v48, %v231_v47  ;;  %v200_v19 = vld [vmem:[%s1000_s2 + $0x1] sm:$0x1]  ;;  %v202_v23 = vld [vmem:[%s1000_s2 + $0x2] sm:$0x1]  ;;  %v361_v33 = vld [vmem:[#allocation6 + $0x8] sm:$0xff] }
  0x42   :  { %668 = vmatprep.subr.bf16.mxu0 %v667_v12  ;;  %v360_v32 = vld [vmem:[#allocation6] sm:$0xff]  ;;  %v362_v35 = vld [vmem:[#allocation6 + $0x10] sm:$0xff]  ;;  %v363_v36 = vld [vmem:[#allocation6 + $0x18] sm:$0xff] }
  0x43   :  { %v364_v38 = vld [vmem:[#allocation6 + $0x20] sm:$0xff]  ;;  %v365_v39 = vld [vmem:[#allocation6 + $0x28] sm:$0xff]  ;;  %v366_v41 = vld [vmem:[#allocation6 + $0x30] sm:$0xff] }
  0x44   :  { %694 = vmatpush3.bf16.msra.mxu1 %v691_v31  ;;  %v367_v42 = vld [vmem:[#allocation6 + $0x38] sm:$0xff]  ;;  %v368_v44 = vld [vmem:[#allocation6 + $0x40] sm:$0xff]  ;;  %v369_v45 = vld [vmem:[#allocation6 + $0x48] sm:$0xff] }
  0x45   :  { %670 = vmatpush3.bf16.msra.mxu0 %v667_v12  ;;  %696 = vmatprep.subr.bf16.mxu1 %v695_v34  ;;  %v370_v47 = vld [vmem:[#allocation6 + $0x50] sm:$0xff]  ;;  %v371_v48 = vld [vmem:[#allocation6 + $0x58] sm:$0xff]  ;;  %v372_v51 = vld [vmem:[#allocation6 + $0x60] sm:$0xff] }
  0x46   :  { %672 = vmatprep.subr.bf16.mxu0 %v671_v15  ;;  %v343_v53 = vld [vmem:[%s1002_s4 + $0x2] sm:$0x1] }
  0x48   :  { %698 = vmatpush3.bf16.msra.mxu1 %v695_v34  ;;  %v719_v34 = vpack.c.bf16 %v361_v33, %v360_v32 }
  0x49   :  { %674 = vmatpush3.bf16.msra.mxu0 %v671_v15  ;;  %700 = vmatprep.subr.bf16.mxu1 %v699_v37 }
  0x4a   :  { %676 = vmatprep.subr.bf16.mxu0 %v675_v18 }
  0x4c   :  { %702 = vmatpush3.bf16.msra.mxu1 %v699_v37  ;;  %v723_v37 = vpack.c.bf16 %v363_v36, %v362_v35  ;;  %v459_v36 = vand.u32 127, %v169_v50 }
  0x4d   :  { %678 = vmatpush3.bf16.msra.mxu0 %v675_v18  ;;  %704 = vmatprep.subr.bf16.mxu1 %v703_v40 }
  0x4e   :  { %680 = vmatprep.subr.bf16.mxu0 %v679_v21  ;;  %vm460_vm1 = vcmp.lt.s32.totalorder %v459_v36, 2 }
  0x50   :  { %706 = vmatpush3.bf16.msra.mxu1 %v703_v40  ;;  %v727_v40 = vpack.c.bf16 %v365_v39, %v364_v38 }
  0x51   :  { %682 = vmatpush3.bf16.msra.mxu0 %v679_v21  ;;  %708 = vmatprep.subr.bf16.mxu1 %v707_v43 }
  0x52   :  { %684 = vmatprep.subr.bf16.mxu0 %v683_v24 }
  0x54   :  { %710 = vmatpush3.bf16.msra.mxu1 %v707_v43  ;;  %v731_v43 = vpack.c.bf16 %v367_v42, %v366_v41 }
  0x55   :  { %686 = vmatpush3.bf16.msra.mxu0 %v683_v24  ;;  %712 = vmatprep.subr.bf16.mxu1 %v711_v46 }
  0x56   :  { %720 = vmatprep.subr.bf16.mxu0 %v719_v34 }
  0x58   :  { %583 = vmatmul.mubr.f32.vlgmr.msra.gmra.mrb[0].mxu0 %v70_v25  ;;  %714 = vmatpush3.bf16.msra.mxu1 %v711_v46  ;;  %v735_v46 = vpack.c.bf16 %v369_v45, %v368_v44 }
  0x59   :  { %716 = vmatprep.subr.bf16.mxu1 %v715_v49  ;;  %722 = vmatpush3.bf16.msra.mxu0 %v719_v34 }
  0x5a   :  { %724 = vmatprep.subr.bf16.mxu0 %v723_v37 }
  0x5c   :  { %718 = vmatpush3.bf16.msra.mxu1 %v715_v49  ;;  %v739_v49 = vpack.c.bf16 %v371_v48, %v370_v47 }
  0x5d   :  { %726 = vmatpush3.bf16.msra.mxu0 %v723_v37  ;;  %v495_v37 = vld [vmem:[%s1004_s6] ss:$0 sm:$0xff] }
  0x5e   :  { %728 = vmatprep.subr.bf16.mxu0 %v727_v40 }
  0x61   :  { %730 = vmatpush3.bf16.msra.mxu0 %v727_v40 }
  0x62   :  { %732 = vmatprep.subr.bf16.mxu0 %v731_v43 }
  0x65   :  { %734 = vmatpush3.bf16.msra.mxu0 %v731_v43 }
  0x66   :  { %736 = vmatprep.subr.bf16.mxu0 %v735_v46 }
  0x69   :  { %738 = vmatpush3.bf16.msra.mxu0 %v735_v46 }
  0x6a   :  { %740 = vmatprep.subr.bf16.mxu0 %v739_v49 }
  0x6d   :  { %742 = vmatpush3.bf16.msra.mxu0 %v739_v49 }
 0x12b   :  { %v584_v54 = vpop.f32.mrb[0].mxu0 }
 0x12c   :  { %v164_v55 = vadd.f32 %v584_v54, %v493_v52  ;;  %v158_v56 = vpop.f32.mrb[1].mxu0 }
 0x12d   :  { %v159_v57 = vadd.f32 %v493_v52, %v158_v56  ;;  %v373_v52 = vld [vmem:[#allocation6 + $0x68] sm:$0xff]  ;;  %v375_v56 = vld [vmem:[#allocation6 + $0x78] sm:$0xff] }
 0x12e   :  { %v168_v58 = vmax.f32 %v164_v55, 0.0  ;;  %v743_v54 = vpack.c.bf16 %v373_v52, %v372_v51  ;;  %v374_v55 = vld [vmem:[#allocation6 + $0x70] sm:$0xff] }
 0x12f   :  { %v167_v59 = vmax.f32 %v159_v57, 0.0  ;;  %v747_v57 = vpack.c.bf16 %v375_v56, %v374_v55 }
 0x130   :  { %v175_v60 = vsel %vm173_vm0, %v168_v58, 0.0  ;;  %744 = vmatprep.subr.bf16.mxu0 %v743_v54 }
 0x131   :  { %v176_v61 = vadd.f32 %v175_v60, %v167_v59  ;;  %746 = vmatpush3.bf16.msra.mxu0 %v743_v54 }
 0x132   :  { %748 = vmatprep.subr.bf16.mxu0 %v747_v57 }
 0x133   :  { %v177_v62 = vrot.slane %v176_v61, 4 }
 0x135   :  { %v178_v63 = vadd.f32 %v177_v62, %v176_v61  ;;  %750 = vmatpush3.bf16.msra.mxu0 %v747_v57 }
 0x137   :  { %v179_v0 = vrot.slane %v178_v63, 2 }
 0x139   :  { %v180_v1 = vadd.f32 %v179_v0, %v178_v63 }
 0x13b   :  { %v181_v2 = vrot.slane %v180_v1, 1 }
 0x13d   :  { %v182_v3 = vadd.f32 %v181_v2, %v180_v1 }
 0x13f   :  { %v183_v4 = vmul.f32 0.083333336, %v182_v3 }
 0x141   :  { %v184_v5 = vsub.f32 %v167_v59, %v183_v4  ;;  %v185_v6 = vsub.f32 %v168_v58, %v183_v4 }
 0x143   :  { %v187_v7 = vsel %vm173_vm0, %v185_v6, 0.0  ;;  %v188_v8 = vmul.f32 %v184_v5, %v184_v5 }
 0x144   :  { %v189_v9 = vmul.f32 %v187_v7, %v187_v7 }
 0x146   :  { %v190_v10 = vadd.f32 %v189_v9, %v188_v8 }
 0x148   :  { %v191_v11 = vrot.slane %v190_v10, 4 }
 0x14a   :  { %v192_v12 = vadd.f32 %v191_v11, %v190_v10 }
 0x14c   :  { %v193_v13 = vrot.slane %v192_v12, 2 }
 0x14e   :  { %v194_v14 = vadd.f32 %v193_v13, %v192_v12 }
 0x150   :  { %v195_v15 = vrot.slane %v194_v14, 1 }
 0x152   :  { %v196_v16 = vadd.f32 %v195_v15, %v194_v14 }
 0x154   :  { %v197_v17 = vmul.f32 0.083333336, %v196_v16 }
 0x156   :  { %v198_v18 = vadd.f32 1e-05, %v197_v17 }
 0x158   :  { %756 = vrsqrt.f32 %v198_v18 }
 0x162   :  { %v757_v21 = vpop.eup %756 }
 0x163   :  { %v201_v22 = vmul.f32 %v757_v21, %v200_v19 }
 0x165   :  { %v203_v24 = vmul.f32 %v201_v22, %v183_v4  ;;  %v208_v25 = vrot.slane %v201_v22, %v960_v20 }
 0x167   :  { %v204_v26 = vsub.f32 %v202_v23, %v203_v24  ;;  %v209_v27 = vmul.f32 %v208_v25, %v167_v59  ;;  %v210_v28 = vmul.f32 %v208_v25, %v168_v58  ;;  %v494_v58 = vld [vmem:[%s1002_s4] ss:$0 sm:$0xff]  ;;  %v341_v25 = vld [vmem:[%s1002_s4 + $0x1] sm:$0x1] }
 0x169   :  { %v214_v29 = vrot.slane %v204_v26, %v960_v20 }
 0x16b   :  { %v215_v30 = vadd.f32 %v214_v29, %v209_v27  ;;  %v216_v31 = vadd.f32 %v214_v29, %v210_v28 }
 0x16d   :  { %617 = vmatprep.mubr.f32.mxu1 %v215_v30 }
 0x16e   :  { %618 = vmatmul.mubr.f32.vlgmr.msra.gmra.mrb[0].mxu1 %v216_v31 }
 0x241   :  { %v619_v59 = vpop.f32.mrb[0].mxu1 }
 0x242   :  { %v310_v60 = vadd.f32 %v619_v59, %v494_v58  ;;  %v304_v61 = vpop.f32.mrb[1].mxu1 }
 0x243   :  { %v305_v62 = vadd.f32 %v494_v58, %v304_v61 }
 0x244   :  { %v314_v63 = vmax.f32 %v310_v60, 0.0 }
 0x245   :  { %v313_v0 = vmax.f32 %v305_v62, 0.0 }
 0x246   :  { %v316_v1 = vsel %vm173_vm0, %v314_v63, 0.0 }
 0x247   :  { %v317_v2 = vadd.f32 %v316_v1, %v313_v0 }
 0x249   :  { %v318_v3 = vrot.slane %v317_v2, 4 }
 0x24b   :  { %v319_v4 = vadd.f32 %v318_v3, %v317_v2 }
 0x24d   :  { %v320_v5 = vrot.slane %v319_v4, 2 }
 0x24f   :  { %v321_v6 = vadd.f32 %v320_v5, %v319_v4 }
 0x251   :  { %v322_v7 = vrot.slane %v321_v6, 1 }
 0x253   :  { %v323_v8 = vadd.f32 %v322_v7, %v321_v6 }
 0x255   :  { %v324_v9 = vmul.f32 0.083333336, %v323_v8 }
 0x257   :  { %v325_v10 = vsub.f32 %v313_v0, %v324_v9  ;;  %v326_v11 = vsub.f32 %v314_v63, %v324_v9 }
 0x259   :  { %v328_v12 = vsel %vm173_vm0, %v326_v11, 0.0  ;;  %v329_v13 = vmul.f32 %v325_v10, %v325_v10 }
 0x25a   :  { %v330_v14 = vmul.f32 %v328_v12, %v328_v12 }
 0x25c   :  { %v331_v15 = vadd.f32 %v330_v14, %v329_v13 }
 0x25e   :  { %v332_v16 = vrot.slane %v331_v15, 4 }
 0x260   :  { %v333_v17 = vadd.f32 %v332_v16, %v331_v15 }
 0x262   :  { %v334_v18 = vrot.slane %v333_v17, 2 }
 0x264   :  { %v335_v19 = vadd.f32 %v334_v18, %v333_v17 }
 0x266   :  { %v336_v21 = vrot.slane %v335_v19, 1 }
 0x268   :  { %v337_v22 = vadd.f32 %v336_v21, %v335_v19 }
 0x26a   :  { %v338_v23 = vmul.f32 0.083333336, %v337_v22 }
 0x26c   :  { %v339_v24 = vadd.f32 1e-05, %v338_v23 }
 0x26e   :  { %758 = vrsqrt.f32 %v339_v24 }
 0x278   :  { %v759_v26 = vpop.eup %758 }
 0x279   :  { %v342_v27 = vmul.f32 %v759_v26, %v341_v25 }
 0x27b   :  { %v349_v28 = vrot.slane %v342_v27, %v960_v20  ;;  %v344_v29 = vmul.f32 %v342_v27, %v324_v9 }
 0x27d   :  { %v350_v30 = vmul.f32 %v349_v28, %v313_v0  ;;  %v345_v31 = vsub.f32 %v343_v53, %v344_v29  ;;  %v351_v32 = vmul.f32 %v349_v28, %v314_v63 }
 0x27f   :  { %v355_v33 = vrot.slane %v345_v31, %v960_v20 }
 0x281   :  { %v356_v34 = vadd.f32 %v355_v33, %v350_v30  ;;  %v357_v35 = vadd.f32 %v355_v33, %v351_v32 }
 0x283   :  { %358 = vst [vmem:[%s1006_s8] sm:$0xff] %v356_v34  ;;  %652 = vmatprep.mubr.f32.mxu0 %v356_v34  ;;  %359 = vst [vmem:[%s1006_s8 + $0x8] sm:$0xff] %v357_v35 }
 0x284   :  { %653 = vmatmul.mubr.f32.vlgmr.msra.gmra.mrb[2].mxu0 %v357_v35 }
 0x357   :  { %v654_v38 = vpop.f32.mrb[2].mxu0 }
 0x358   :  { %v449_v20 = vpop.f32.mrb[3].mxu0  ;;  %v455_v40 = vadd.f32 %v654_v38, %v495_v37 }
 0x359   :  { %v450_v39 = vadd.f32 %v495_v37, %v449_v20 }
 0x35a   :  { %v462_v42 = vsel %vm460_vm1, %v455_v40, -1e+30 }
 0x35b   :  { %v461_v41 = vsel %vm460_vm1, %v450_v39, -1e+30 }
 0x35c   :  { %463 = vmax.xlane.f32.xlu0 %v461_v41 }
 0x360   :  { %465 = vmax.xlane.f32.xlu0 %v462_v42 }
 0x3e9   :  { %v464_v43 = vpop.xlane.xlu0 %463 }
 0x3ea   :  { %v467_v44 = vsub.f32 %v461_v41, %v464_v43 }
 0x3ec   :  { %v469_v45 = vmul.f32 1.442695, %v467_v44 }
 0x3ed   :  { %v466_v46 = vpop.xlane.xlu0 %465 }
 0x3ee   :  { %760 = vpow2.f32 %v469_v45  ;;  %v468_v47 = vsub.f32 %v462_v42, %v466_v46 }
 0x3f0   :  { %v471_v50 = vmul.f32 1.442695, %v468_v47 }
 0x3f2   :  { %762 = vpow2.f32 %v471_v50 }
 0x3f8   :  { %v761_v48 = vpop.eup %760 }
 0x3f9   :  { %473 = vadd.xlane.f32.xlu1 %v761_v48 }
 0x3fc   :  { %v763_v49 = vpop.eup %762 }
 0x3fd   :  { %475 = vadd.xlane.f32.xlu1 %v763_v49 }
 0x486   :  { %v474_v51 = vpop.xlane.xlu1 %473 }
 0x487   :  { %764 = vrcp.f32 %v474_v51 }
 0x48a   :  { %v476_v52 = vpop.xlane.xlu1 %475 }
 0x48b   :  { %766 = vrcp.f32 %v476_v52 }
 0x491   :  { %v765_v54 = vpop.eup %764 }
 0x492   :  { %v479_v55 = vmul.f32 %v765_v54, %v761_v48 }
 0x494   :  { %481 = vst [vmem:[%s1005_s7] sm:$0xff] %v479_v55 }
 0x495   :  { %v767_v56 = vpop.eup %766 }
 0x496   :  { %v480_v57 = vmul.f32 %v767_v56, %v763_v49 }
 0x498   :  { %482 = vst [vmem:[%s1005_s7 + $0x8] sm:$0xff] %v480_v57 }
 0x499   :  { %491 = vsyncpa [#allocation3], 1 }
 0x49a   :  { %492 = vsyncpa [#allocation5], 1 }

</bundles_post_ra>
